<compile_context>
chip_gen: v5e
topology: v5e:2x2
jax: 0.10.0
libtpu: 0.0.40
codegen_flags: <defaults>
</compile_context>

<pallas_src>
from functools import partial

import jax
import jax.numpy as jnp
from jax.experimental import pallas as pl
from jax.experimental.pallas import tpu as pltpu


def _exact_gelu(x):
    # PyTorch F.gelu default is the exact (erf-based) GELU.
    return 0.5 * x * (1.0 + jax.lax.erf(x * 0.7071067811865475))


def conv_mlp_kernel(x_ref, w1_ref, b1_ref, w2_ref, b2_ref, o_ref, *,
                    block_n, approximate_gelu):
    # x_ref:  (block_n, Cin, T)  input slab(s); T spatial tokens on the lane axis
    # w1_ref: (Cmid, Cin)        compute dtype
    # b1_ref: (Cmid, 1)          elementwise dtype
    # w2_ref: (Cout, Cmid)       compute dtype
    # b2_ref: (Cout, 1)          f32
    # o_ref:  (block_n, Cout, T)
    w1 = w1_ref[...]
    w2 = w2_ref[...]
    b1 = b1_ref[...]
    b2 = b2_ref[...]
    # Short static unroll over the images packed into this grid step.
    for i in range(block_n):
        # Cast the tile to the MXU operand dtype in VMEM (free-ish); the input
        # stays in its native dtype in HBM (no extra HBM pass in the wrapper).
        x = x_ref[i].astype(w1.dtype)                                   # (Cin, T)
        h = jnp.dot(w1, x, preferred_element_type=jnp.float32)          # (Cmid, T) f32 acc
        # Bias add + GELU in the elementwise dtype (f32 by default; bf16 on
        # v6e/v7x via elementwise_dtype for ~2x VPU throughput).
        h = h.astype(b1.dtype) + b1
        if approximate_gelu:
            h = jax.nn.gelu(h, approximate=True)    # tanh -> EUP slot (off the VALU)
        else:
            h = _exact_gelu(h)                      # erf -> PyTorch-exact numerics
        y = jnp.dot(w2, h.astype(w2.dtype),
                    preferred_element_type=jnp.float32)                 # (Cout, T) f32 acc
        y = y + b2
        o_ref[i] = y.astype(o_ref.dtype)


def conv_mlp_pallas(x_nchw, w1, b1, w2, b2, *,
                    tile_hw=None, block_n=None,
                    compute_dtype=None, elementwise_dtype=None,
                    approximate_gelu=False):
    """ConvMLP forward: y = conv1x1_2(gelu(conv1x1_1(x))).

    x_nchw: (N, Cin, H, W);  w1: (Cmid, Cin, 1, 1), b1: (Cmid,);
    w2: (Cout, Cmid, 1, 1), b2: (Cout,).  Returns (N, Cout, H, W).

    compute_dtype:     MXU operand dtype (e.g. jnp.bfloat16). Accumulation is
                       always f32. Input is cast in-kernel, never in HBM.
    elementwise_dtype: dtype for bias add + GELU (default f32). Set to
                       jnp.bfloat16 on v6e/v7x (bf16-native VPU); no gain on v5e.
    approximate_gelu:  False (default) = exact erf GELU (PyTorch parity);
                       True = tanh approximation (transcendental runs on EUP).
    """
    N, Cin, H, W = x_nchw.shape
    Cmid = w1.shape[0]
    Cout = w2.shape[0]
    HW = H * W

    out_dtype = x_nchw.dtype
    x_dtype = x_nchw.dtype
    compute_dtype = jnp.dtype(compute_dtype) if compute_dtype is not None else jnp.dtype(x_dtype)
    ew_dtype = jnp.dtype(elementwise_dtype) if elementwise_dtype is not None else jnp.dtype(jnp.float32)

    x_bytes = jnp.dtype(x_dtype).itemsize
    act_bytes = compute_dtype.itemsize
    out_bytes = jnp.dtype(out_dtype).itemsize
    ew_bytes = ew_dtype.itemsize

    # NCHW -> (N, Cin, H*W): metadata-only reshape. IMPORTANT: no .astype here —
    # the kernel casts tiles in VMEM, avoiding an extra full-tensor HBM pass.
    x_flat = x_nchw.reshape(N, Cin, HW)

    # Conv2d 1x1 weights (out, in, 1, 1) -> (out, in); biases as column vectors.
    w1_m = w1.reshape(Cmid, Cin).astype(compute_dtype)
    w2_m = w2.reshape(Cout, Cmid).astype(compute_dtype)
    b1_m = b1.reshape(Cmid, 1).astype(ew_dtype)
    b2_m = b2.reshape(Cout, 1).astype(jnp.float32)

    # --- VMEM working-set model (bytes per spatial token of one image) -------
    #   x tile   (double-buffered): 2 * Cin  * x_bytes
    #   out tile (double-buffered): 2 * Cout * out_bytes
    #   in-kernel x cast temp     : Cin  * act_bytes
    #   h  (f32 MXU accumulate)   : Cmid * 4
    #   bias+GELU temp            : Cmid * ew_bytes
    #   y  (f32 MXU accumulate)   : Cout * 4
    per_token = (2 * Cin * x_bytes + 2 * Cout * out_bytes + Cin * act_bytes
                 + Cmid * (4 + ew_bytes) + Cout * 4)
    # Weights/biases are single-buffered (pl.Buffered(1)) since grid-invariant.
    weight_bytes = (Cmid * Cin + Cout * Cmid) * act_bytes + Cmid * ew_bytes + Cout * 4

    VMEM_WORKSET_BUDGET = 32 * 1024 * 1024   # leaves headroom under v7x's 64 MiB
    max_tokens = max(128, (VMEM_WORKSET_BUDGET - weight_bytes) // per_token)

    # --- Spatial tile: lane-dense and chosen to avoid HBM pad/slice ----------
    if tile_hw is None:
        cap = int(min(HW, 32 * 1024, max_tokens))
        if HW <= cap:
            tile_hw = HW                      # whole image; block == full dim is legal
        else:
            tile_hw = 0
            d = (cap // 128) * 128
            while d >= 128:                   # largest multiple-of-128 divisor of HW
                if HW % d == 0:
                    tile_hw = d
                    break
                d -= 128
            if tile_hw == 0:                  # ragged HW: padding fallback only
                tile_hw = max(128, (cap // 128) * 128)
    else:
        tile_hw = int(min(tile_hw, HW))
        if tile_hw < HW:
            tile_hw = max(128, ((tile_hw + 127) // 128) * 128)

    n_hw_tiles = pl.cdiv(HW, tile_hw)
    HW_eff = n_hw_tiles * tile_hw
    if HW_eff != HW:
        # Last-resort HBM padding (costs one extra pass); avoided whenever a
        # whole-image tile or an exact multiple-of-128 divisor exists.
        x_flat = jnp.pad(x_flat, ((0, 0), (0, 0), (0, HW_eff - HW)))

    # --- Images per grid step: amortize per-step overhead on small images ----
    # Keep >= 4 total grid steps when there is enough work so v7x's two
    # TensorCores (dimension_semantics="parallel") both stay busy.
    if block_n is None:
        max_bn_vmem = max(1, max_tokens // tile_hw)
        need_images = max(1, -(-4 // n_hw_tiles))          # ceil(4 / n_hw_tiles)
        max_bn_steps = max(1, N // need_images)
        block_n = int(min(N, 8, max_bn_vmem, max_bn_steps))  # 8 caps the unroll
    block_n = max(1, min(int(block_n), N))
    while N % block_n != 0:
        block_n -= 1

    grid = (N // block_n, n_hw_tiles)

    # --- Explicit scoped-VMEM limit -------------------------------------------
    # Includes the f32 intermediates (not just pipelined buffers). v5e's default
    # scoped limit is only 16 MiB, so set it explicitly; cap at 48 MiB so v7x
    # (64 MiB physical per TC) keeps compiler-scratch headroom.
    vmem_need = weight_bytes + block_n * tile_hw * per_token
    vmem_limit = int(min(48 * 1024 * 1024,
                         max(int(1.25 * vmem_need) + (2 << 20), 16 * 1024 * 1024)))

    kernel = partial(conv_mlp_kernel, block_n=block_n,
                     approximate_gelu=approximate_gelu)

    out_flat = pl.pallas_call(
        kernel,
        out_shape=jax.ShapeDtypeStruct((N, Cout, HW_eff), out_dtype),
        grid_spec=pltpu.PrefetchScalarGridSpec(
            num_scalar_prefetch=0,
            grid=grid,
            in_specs=[
                pl.BlockSpec((block_n, Cin, tile_hw), lambda n, t: (n, 0, t)),   # x
                # Grid-invariant operands: single pipeline buffer.
                pl.BlockSpec((Cmid, Cin), lambda n, t: (0, 0),
                             pipeline_mode=pl.Buffered(1)),                      # W1
                pl.BlockSpec((Cmid, 1), lambda n, t: (0, 0),
                             pipeline_mode=pl.Buffered(1)),                      # b1
                pl.BlockSpec((Cout, Cmid), lambda n, t: (0, 0),
                             pipeline_mode=pl.Buffered(1)),                      # W2
                pl.BlockSpec((Cout, 1), lambda n, t: (0, 0),
                             pipeline_mode=pl.Buffered(1)),                      # b2
            ],
            out_specs=pl.BlockSpec((block_n, Cout, tile_hw), lambda n, t: (n, 0, t)),
        ),
        compiler_params=pltpu.CompilerParams(
            dimension_semantics=("parallel", "parallel"),
            vmem_limit_bytes=vmem_limit,
        ),
    )(x_flat, w1_m, b1_m, w2_m, b2_m)

    if HW_eff != HW:
        out_flat = out_flat[:, :, :HW]
    # Restore NCHW — metadata-only reshape.
    return out_flat.reshape(N, Cout, H, W)


def conv_mlp_ref(x_nchw, w1, b1, w2, b2):
    """Pure-JAX reference matching PyTorch ConvMLP.forward (exact GELU)."""
    N, Cin, H, W = x_nchw.shape
    Cmid, Cout = w1.shape[0], w2.shape[0]
    xf = x_nchw.reshape(N, Cin, H * W)
    h = jnp.einsum("oc,ncs->nos", w1.reshape(Cmid, Cin), xf) + b1[None, :, None]
    h = jax.nn.gelu(h, approximate=False)
    y = jnp.einsum("oc,ncs->nos", w2.reshape(Cout, Cmid), h) + b2[None, :, None]
    return y.reshape(N, Cout, H, W)


if __name__ == "__main__":
    # Shapes consistent with ConvMLP(in_channels=4, out_channels=4,
    # mid_channels=32) applied to a (2, 4, 16, 16) input.
    N, Cin, Cmid, Cout, H, W = 2, 4, 32, 4, 16, 16

    key = jax.random.PRNGKey(0)
    kx, kw1, kb1, kw2, kb2 = jax.random.split(key, 5)

    x = jax.random.normal(kx, (N, Cin, H, W), dtype=jnp.float32)
    w1 = jax.random.normal(kw1, (Cmid, Cin, 1, 1), dtype=jnp.float32) * 0.1
    b1 = jax.random.normal(kb1, (Cmid,), dtype=jnp.float32) * 0.1
    w2 = jax.random.normal(kw2, (Cout, Cmid, 1, 1), dtype=jnp.float32) * 0.1
    b2 = jax.random.normal(kb2, (Cout,), dtype=jnp.float32) * 0.1

    ref = conv_mlp_ref(x, w1, b1, w2, b2)

    # 1) Full precision, exact GELU — matches PyTorch default numerics.
    out = jax.block_until_ready(conv_mlp_pallas(x, w1, b1, w2, b2))
    assert out.shape == (N, Cout, H, W)
    assert jnp.allclose(out, ref, atol=1e-5, rtol=1e-5), "f32 mismatch vs reference"

    # 2) bf16 MXU operands (halved weight/activation operand traffic); the input
    #    stays f32 in HBM and is cast to bf16 inside the kernel; accumulation,
    #    bias and exact GELU stay f32.
    out_bf16 = jax.block_until_ready(
        conv_mlp_pallas(x, w1, b1, w2, b2, compute_dtype=jnp.bfloat16))
    assert jnp.allclose(out_bf16, ref, atol=5e-2, rtol=5e-2), "bf16 mismatch vs reference"

    # 3) tanh-approximate GELU: moves the per-element transcendental onto the
    #    EUP slot (the exact-erf polynomial is the VALU bottleneck for these
    #    channel counts). Opt-in since it deviates slightly from exact erf.
    out_tanh = jax.block_until_ready(
        conv_mlp_pallas(x, w1, b1, w2, b2, approximate_gelu=True))
    assert jnp.allclose(out_tanh, ref, atol=2e-2, rtol=2e-2), "tanh-gelu mismatch vs reference"

    print("KERNEL_OK")
</pallas_src>

<mosaic_0001>
module attributes {stable_mosaic.version = 11 : i64} {
  func.func @conv_mlp_kernel(%arg0: i32, %arg1: i32, %arg2: memref<1x4x256xf32, #tpu.memory_space<vmem>>, %arg3: memref<32x4xf32, #tpu.memory_space<vmem>>, %arg4: memref<32x1xf32, #tpu.memory_space<vmem>>, %arg5: memref<4x32xf32, #tpu.memory_space<vmem>>, %arg6: memref<4x1xf32, #tpu.memory_space<vmem>>, %arg7: memref<1x4x256xf32, #tpu.memory_space<vmem>>) attributes {dimension_semantics = [#tpu.dimension_semantics<parallel>, #tpu.dimension_semantics<parallel>], iteration_bounds = array<i64: 2, 1>, scalar_prefetch = 0 : i64, scratch_operands = 0 : i64, tpu.core_type = #tpu.core_type<tc>, window_params = [{transform_indices = @transform_0, window_bounds = array<i64: 1, 4, 256>}, {pipeline_mode = #tpu.pipeline_mode<synchronous>, transform_indices = @transform_1, window_bounds = array<i64: 32, 4>}, {pipeline_mode = #tpu.pipeline_mode<synchronous>, transform_indices = @transform_2, window_bounds = array<i64: 32, 1>}, {pipeline_mode = #tpu.pipeline_mode<synchronous>, transform_indices = @transform_3, window_bounds = array<i64: 4, 32>}, {pipeline_mode = #tpu.pipeline_mode<synchronous>, transform_indices = @transform_4, window_bounds = array<i64: 4, 1>}, {transform_indices = @transform_5, window_bounds = array<i64: 1, 4, 256>}]} {
    %c0 = arith.constant 0 : index
    %c0_0 = arith.constant 0 : index
    %0 = vector.load %arg3[%c0, %c0_0] : memref<32x4xf32, #tpu.memory_space<vmem>>, vector<32x4xf32>
    %c0_1 = arith.constant 0 : index
    %c0_2 = arith.constant 0 : index
    %1 = vector.load %arg5[%c0_1, %c0_2] : memref<4x32xf32, #tpu.memory_space<vmem>>, vector<4x32xf32>
    %c0_3 = arith.constant 0 : index
    %c0_4 = arith.constant 0 : index
    %2 = vector.load %arg4[%c0_3, %c0_4] : memref<32x1xf32, #tpu.memory_space<vmem>>, vector<32x1xf32>
    %c0_5 = arith.constant 0 : index
    %c0_6 = arith.constant 0 : index
    %3 = vector.load %arg6[%c0_5, %c0_6] : memref<4x1xf32, #tpu.memory_space<vmem>>, vector<4x1xf32>
    %c0_7 = arith.constant 0 : index
    %c0_8 = arith.constant 0 : index
    %c0_9 = arith.constant 0 : index
    %4 = vector.load %arg2[%c0_7, %c0_8, %c0_9] : memref<1x4x256xf32, #tpu.memory_space<vmem>>, vector<1x4x256xf32>
    %5 = vector.shape_cast %4 : vector<1x4x256xf32> to vector<4x256xf32>
    %cst = arith.constant dense<0.000000e+00> : vector<32x256xf32>
    %6 = tpu.matmul %0, %5, %cst {dimension_numbers = #tpu.dot_dimension_numbers<[1], [0], [0], [1], [0, 0, 1, 1], [], []>} : vector<32x4xf32>, vector<4x256xf32>, vector<32x256xf32> -> vector<32x256xf32>
    %7 = vector.broadcast %2 : vector<32x1xf32> to vector<32x256xf32>
    %8 = arith.addf %6, %7 : vector<32x256xf32>
    %cst_10 = arith.constant 5.000000e-01 : f32
    %9 = vector.broadcast %cst_10 : f32 to vector<32x256xf32>
    %10 = arith.mulf %9, %8 : vector<32x256xf32>
    %cst_11 = arith.constant 0.707106769 : f32
    %11 = vector.broadcast %cst_11 : f32 to vector<32x256xf32>
    %12 = arith.mulf %8, %11 : vector<32x256xf32>
    %13 = math.erf %12 : vector<32x256xf32>
    %cst_12 = arith.constant 1.000000e+00 : f32
    %14 = vector.broadcast %cst_12 : f32 to vector<32x256xf32>
    %15 = arith.addf %14, %13 : vector<32x256xf32>
    %16 = arith.mulf %10, %15 : vector<32x256xf32>
    %cst_13 = arith.constant dense<0.000000e+00> : vector<4x256xf32>
    %17 = tpu.matmul %1, %16, %cst_13 {dimension_numbers = #tpu.dot_dimension_numbers<[1], [0], [0], [1], [0, 0, 1, 1], [], []>} : vector<4x32xf32>, vector<32x256xf32>, vector<4x256xf32> -> vector<4x256xf32>
    %18 = vector.broadcast %3 : vector<4x1xf32> to vector<4x256xf32>
    %19 = arith.addf %17, %18 : vector<4x256xf32>
    %c0_14 = arith.constant 0 : index
    %c0_15 = arith.constant 0 : index
    %c0_16 = arith.constant 0 : index
    %20 = vector.load %arg7[%c0_14, %c0_15, %c0_16] : memref<1x4x256xf32, #tpu.memory_space<vmem>>, vector<1x4x256xf32>
    %21 = vector.shape_cast %20 : vector<1x4x256xf32> to vector<4x256xf32>
    %22 = vector.shape_cast %19 : vector<4x256xf32> to vector<1x4x256xf32>
    tpu.vector_store %arg7[%c0_14, %c0_15, %c0_16], %22 {strides = array<i32>} : memref<1x4x256xf32, #tpu.memory_space<vmem>>, vector<1x4x256xf32>,
    return
  }
  func.func @transform_0(%arg0: i32, %arg1: i32) -> (i32, i32, i32) {
    %c0_i32 = arith.constant 0 : i32
    %c0_i32_0 = arith.constant 0 : i32
    return %arg0, %c0_i32, %arg1 : i32, i32, i32
  }
  func.func @transform_1(%arg0: i32, %arg1: i32) -> (i32, i32) {
    %c0_i32 = arith.constant 0 : i32
    %c0_i32_0 = arith.constant 0 : i32
    %c0_i32_1 = arith.constant 0 : i32
    return %c0_i32, %c0_i32_0 : i32, i32
  }
  func.func @transform_2(%arg0: i32, %arg1: i32) -> (i32, i32) {
    %c0_i32 = arith.constant 0 : i32
    %c0_i32_0 = arith.constant 0 : i32
    %c0_i32_1 = arith.constant 0 : i32
    return %c0_i32, %c0_i32_0 : i32, i32
  }
  func.func @transform_3(%arg0: i32, %arg1: i32) -> (i32, i32) {
    %c0_i32 = arith.constant 0 : i32
    %c0_i32_0 = arith.constant 0 : i32
    %c0_i32_1 = arith.constant 0 : i32
    return %c0_i32, %c0_i32_0 : i32, i32
  }
  func.func @transform_4(%arg0: i32, %arg1: i32) -> (i32, i32) {
    %c0_i32 = arith.constant 0 : i32
    %c0_i32_0 = arith.constant 0 : i32
    %c0_i32_1 = arith.constant 0 : i32
    return %c0_i32, %c0_i32_0 : i32, i32
  }
  func.func @transform_5(%arg0: i32, %arg1: i32) -> (i32, i32, i32) {
    %c0_i32 = arith.constant 0 : i32
    %c0_i32_0 = arith.constant 0 : i32
    return %arg0, %c0_i32, %arg1 : i32, i32, i32
  }
}

</mosaic_0001>

<bundles_post_ra>
// kernel: tpu_custom_call.1
= control target key start
LH: loop header
LB: loop body
LE: loop exit
PB: predicated region body
PF: predicated region fallthrough
CT: control target
= control target key end

     0   :  { %10 = vsyncpa [#allocation3], 0  ;;  %s1523_s0 = inlined_call_operand.vmem [shape: f32[2,4,256], index: 0, kind: input, shape index: {}]   ;;  %s1524_s1 = inlined_call_operand.vmem [shape: f32[32,4], index: 1, kind: input, shape index: {}]   ;;  %s1525_s2 = inlined_call_operand.vmem [shape: f32[32,1], index: 2, kind: input, shape index: {}]   ;;  %s1526_s3 = inlined_call_operand.vmem [shape: f32[4,32], index: 3, kind: input, shape index: {}]   ;;  %s1527_s4 = inlined_call_operand.vmem [shape: f32[4,1], index: 4, kind: input, shape index: {}]   ;;  %s1528_s5 = inlined_call_operand.hbm [shape: f32[2,4,256], index: 5, kind: output, shape index: {}]  }
   0x1   :  { %12 = vsyncpa [#allocation3 + $0x1], 0  ;;  %s1090_s18 = smov 0   ;;  %s1092_s19 = smov 0  }
   0x2   :  { %s1094_s20 = smov 0   ;;  %s1096_s21 = smov 0  }
   0x3   :  { %s1098_s22 = smov 0   ;;  %s1100_s23 = smov 0  }
   0x4 LB: > { %s867_s24 = sadd.s32 4294967295, %s1057_s23   ;;  %s868_s25 = sadd.s32 4294967294, %s1057_s23   ;;  %s1057_s23 = sphi %s1100_s23, %s18_s23   ;;  %s1053_s22 = sphi %s1098_s22, %s1545_s22   ;;  %s1049_s21 = sphi %s1096_s21, %s1544_s21   ;;  %s1045_s20 = sphi %s1094_s20, %s1543_s20   ;;  %s1041_s19 = sphi %s1092_s19, %s1542_s19   ;;  %s1037_s18 = sphi %s1090_s18, %s1541_s18  }
   0x5   : > { %s30_s26 = sadd.s32 1, %s1053_s22  ;;  %s151_s27 = sadd.s32 1, %s1045_s20 }
   0x6   : > { %p32_p0 = scmp.ge.s32.totalorder %s30_s26, 2  ;;  %p161_p1 = scmp.ne.s32.totalorder %s1045_s20, %s1041_s19 }
   0x7   : > { %p162_p2 = scmp.eq.s32.totalorder %s867_s24, 1  ;;  %p167_p3 = scmp.ne.s32.totalorder %s1041_s19, %s1037_s18 }
   0x8   : > { %s1547_s26 = smov (%p32_p0, %s30_s26), 0  ;;  %p168_p5 = scmp.eq.s32.totalorder %s868_s25, 1 }
   0x9   : > { %p1130_p4 = por %p162_p2, %p161_p1  ;;  %s146_s29 = ssub.s32 %s1053_s22, %s1547_s26 }
   0xa   : > { %p871_p6 = scmp.ge.s32.totalorder %s1057_s23, 1  ;;  %p149_p7 = scmp.eq.s32.totalorder %s146_s29, 0 }
   0xb   : > { %p1137_p8 = por %p168_p5, %p167_p3  ;;  %p211_p9 = scmp.lt.s32.totalorder %s1057_s23, 3 }
   0xc   : > { %s1143_s6 = scalar_select %p149_p7, %s1045_s20, %s151_s27  }
   0xd   : > { %p212_p10 = pnand %p871_p6, %p211_p9 }
   0xe   : > { %p244_p11 = scmp.lt.s32.totalorder (!%p212_p10), %s1049_s21, 1  ;;  %s240_s17 = sand.u32 (!%p212_p10), 1, %s1041_s19  }
   0xf   : > { %215 = sbr.rel (%p212_p10) target bundleno = 414 (0x19e), region = 40  ;;  %s872_s24 = sshll.u32 (!%p212_p10), %s240_s17, 3 }
  0x10   : > { %s901_s25 = sshll.u32 (!%p212_p10), %s1049_s21, 3  ;;  %s242_s8 = scalar_lea.vmem (!%p212_p10), [#allocation2], %s872_s24 }
  0x11   : > { %s786_s7 = scalar_lea.hbm (!%p212_p10), %s1528_s5, %s901_s25  ;;  %s788_s9 = sshll.u32 (!%p212_p10), %s242_s8, 4  ;;  %s789_s9 = int_to_ptr.vmem [resolvable:$true] %s788_s9 }
  0x12   : > { %s790_s10 = sshll.u32 (!%p212_p10), %s786_s7, 4  ;;  %s791_s10 = int_to_ptr.hbm [resolvable:$true] %s790_s10 }
  0x14   : > { %v1059_v0 = vmov 0   ;;  %v260_v1 = vld [vmem:[%s1525_s2 + $0x8] sm:$0xff]  ;;  %v262_v2 = vld [vmem:[%s1525_s2 + $0x18] sm:$0xff]  ;;  %s245_s11 = scalar_select %p244_p11, %s1049_s21, 1  ;;  %v259_v4 = vld [vmem:[%s1525_s2] sm:$0xff]  ;;  %vm302_vm0 = vcmask 1043456  }
  0x15   : > { %961 = vset.pattern.permute.xlu1 %v1059_v0  ;;  %960 = vset.pattern.permute.xlu0 %v1059_v0  ;;  %v261_v5 = vld [vmem:[%s1525_s2 + $0x10] sm:$0xff]  ;;  %v254_v6 = vld [vmem:[%s1524_s1] sm:$0xff]  ;;  %vm289_vm1 = vcmask 31744   ;;  %v257_v7 = vld [vmem:[%s1524_s1 + $0x18] sm:$0xff]  ;;  %s773_s21 = scalar_lea.sflag [#allocation3], %s240_s17 }
  0x16   : > { %272 = vperm.xlu1 %961, %v260_v1   ;;  %282 = vperm.xlu0 %960, %v262_v2   ;;  %s900_s12 = sshll.u32 %s245_s11, 3  ;;  %v255_v10 = vld [vmem:[%s1524_s1 + $0x8] sm:$0xff]  ;;  %v256_v11 = vld [vmem:[%s1524_s1 + $0x10] sm:$0xff]  ;;  %s993_s11 = sshra.s32 %s791_s10, 4  ;;  %s994_s11 = int_to_ptr.hbm [resolvable:$true] %s993_s11 }
  0x17   : > { %962 = vset.pattern.permute.xlu2 %v1059_v0  ;;  %s251_s15 = scalar_lea.vmem %s1523_s0, %s900_s12  ;;  %s995_s12 = scalar_lea.hbm %s994_s11, 8 }
  0x18   : > { %v264_v3 = vld [vmem:[%s251_s15] sm:$0xff]  ;;  %p996_p12 = scmp.ne.s32.totalorder %s994_s11, %s995_s12  ;;  %s999_s15 = scalar_lea.hbm %s1528_s5, 16 }
  0x19   : > { %286 = vst [vmem:[#allocation1] ss:$2 sm:$0xff] %v264_v3  ;;  %p1000_p1 = scmp.lt.s32.totalorder %s994_s11, %s1528_s5  ;;  %p1001_p2 = scmp.lt.s32.totalorder %s999_s15, %s995_s12 }
  0x1a   : > { %p997_p13 = pnand %p996_p12, %p1130_p4 }
  0x1b   : > { %p1002_p3 = por %p1001_p2, %p1000_p1 }
  0x1c   : > { %p998_p0 = pneg %p997_p13 }
  0x1e   : > { %267 = vperm.xlu1 %961, %v259_v4   ;;  %277 = vperm.xlu0 %960, %v261_v5   ;;  %p1003_p5 = pnand %p1002_p3, %p998_p0 }
  0x20   : > { %v287_v8 = vld.sshfl [vmem:[#allocation1] sm:$0xff pattern:$0x75316420]  ;;  %v288_v9 = vld.sshfl [vmem:[#allocation1 + $0x8] sm:$0xff pattern:$0x75316420] }
  0x21   : > { %875 = vmatpush.msk.msra.mxu0 %vm302_vm0, %v287_v8  ;;  %902 = vmatpush.msk.msra.mxu2 %vm302_vm0, %v287_v8 }
  0x22   : > { %880 = vmatpush.msk.msra.mxu1 %vm302_vm0, %v288_v9  ;;  %903 = vmatpush.msk.msra.mxu3 %vm302_vm0, %v288_v9 }
  0x23   : > { %876 = vmatmul.msk.f32.vlgmr.msra.gmra.mxu0 %vm289_vm1, %v254_v6  ;;  %879 = vmatmul.msk.f32.vlgmr.msra.gmra.mxu2 %vm289_vm1, %v257_v7 }
  0x24   : > { %881 = vmatmul.msk.f32.vlgmr.msra.gmra.mxu1 %vm289_vm1, %v254_v6  ;;  %884 = vmatmul.msk.f32.vlgmr.msra.gmra.mxu3 %vm289_vm1, %v257_v7 }
  0x2b   : > { %877 = vmatmul.msk.f32.gmra.mxu0 %vm289_vm1, %v255_v10 }
  0x2c   : > { %882 = vmatmul.msk.f32.gmra.mxu1 %vm289_vm1, %v255_v10 }
  0x33   : > { %878 = vmatmul.msk.f32.gmra.mxu0 %vm289_vm1, %v256_v11 }
  0x34   : > { %883 = vmatmul.msk.f32.gmra.mxu1 %vm289_vm1, %v256_v11 }
  0x88   : > { %v273_v12 = vpop.permute.xlu1 %272  ;;  %v283_v18 = vpop.permute.xlu0 %282 }
  0x90   : > { %v268_v13 = vpop.permute.xlu1 %267  ;;  %v278_v46 = vpop.permute.xlu0 %277 }
  0xa0   : > { %v324_v14 = vpop.f32.mrf.mxu0 }
  0xa1   : > { %v1186_v15 = vadd.f32 %v324_v14, %v268_v13  ;;  %v353_v16 = vpop.f32.mrf.mxu1 }
  0xa2   : > { %v1191_v19 = vadd.f32 %v353_v16, %v268_v13 }
  0xa3   : > { %v1189_v17 = vmul.f32 0.70710677, %v1186_v15 }
  0xa4   : > { %v1205_v29 = vmul.f32 0.70710677, %v1191_v19 }
  0xa5   : > { %v381_v21 = vmul.f32 %v1189_v17, %v1189_v17 }
  0xa6   : > { %v333_v20 = vpop.f32.mrf.mxu2  ;;  %v421_v39 = vmul.f32 %v1205_v29, %v1205_v29 }
  0xa7   : > { %v1195_v22 = vadd.f32 %v333_v20, %v283_v18  ;;  %v362_v23 = vpop.f32.mrf.mxu3  ;;  %v1212_v32 = vmin.f32 %v381_v21, 16.0 }
  0xa8   : > { %v1197_v24 = vadd.f32 %v362_v23, %v283_v18  ;;  %v327_v25 = vpop.f32.mrf.mxu0  ;;  %v1242_v53 = vmin.f32 %v421_v39, 16.0 }
  0xa9   : > { %v1200_v26 = vmul.f32 0.70710677, %v1195_v22  ;;  %v1202_v27 = vadd.f32 %v327_v25, %v273_v12  ;;  %v356_v28 = vpop.f32.mrf.mxu1  ;;  %v383_v42 = vmul.f32 2.1237322e-06, %v1212_v32 }
  0xaa   : > { %v1208_v30 = vmul.f32 0.70710677, %v1197_v24  ;;  %v1210_v31 = vadd.f32 %v356_v28, %v273_v12  ;;  %v423_v1 = vmul.f32 2.1237322e-06, %v1242_v53 }
  0xab   : > { %v621_v33 = vmul.f32 %v1200_v26, %v1200_v26  ;;  %v1217_v34 = vmul.f32 0.70710677, %v1202_v27  ;;  %v384_v56 = vadd.f32 0.00028619796, %v383_v42 }
  0xac   : > { %v661_v35 = vmul.f32 %v1208_v30, %v1208_v30  ;;  %v1222_v36 = vmul.f32 0.70710677, %v1210_v31  ;;  %v424_v16 = vadd.f32 0.00028619796, %v423_v1 }
  0xad   : > { %v1224_v37 = vmin.f32 %v621_v33, 16.0  ;;  %v461_v38 = vmul.f32 %v1217_v34, %v1217_v34  ;;  %v385_v5 = vmul.f32 %v384_v56, %v1212_v32 }
  0xae   : > { %v1230_v40 = vmin.f32 %v661_v35, 16.0  ;;  %v501_v41 = vmul.f32 %v1222_v36, %v1222_v36  ;;  %v425_v42 = vmul.f32 %v424_v16, %v1242_v53 }
  0xaf   : > { %v623_v43 = vmul.f32 2.1237322e-06, %v1224_v37  ;;  %v1236_v44 = vmin.f32 %v461_v38, 16.0  ;;  %v386_v23 = vadd.f32 0.0036580483, %v385_v5 }
  0xb0   : > { %v663_v45 = vmul.f32 2.1237322e-06, %v1230_v40  ;;  %v1239_v47 = vmin.f32 %v501_v41, 16.0  ;;  %v330_v48 = vpop.f32.mrf.mxu0 }
  0xb1   : > { %v624_v49 = vadd.f32 0.00028619796, %v623_v43  ;;  %v463_v50 = vmul.f32 2.1237322e-06, %v1236_v44  ;;  %v331_v51 = vadd.f32 %v330_v48, %v278_v46  ;;  %v359_v52 = vpop.f32.mrf.mxu1  ;;  %v1276_v43 = vmul.f32 0.5, %v1195_v22 }
  0xb2   : > { %v664_v54 = vadd.f32 0.00028619796, %v663_v45  ;;  %v503_v55 = vmul.f32 2.1237322e-06, %v1239_v47  ;;  %v1246_v59 = vadd.f32 %v359_v52, %v278_v46  ;;  %v387_v48 = vmul.f32 %v386_v23, %v1212_v32 }
  0xb3   : > { %v625_v57 = vmul.f32 %v624_v49, %v1224_v37  ;;  %v464_v58 = vadd.f32 0.00028619796, %v463_v50  ;;  %v1249_v62 = vmul.f32 0.70710677, %v331_v51  ;;  %v1281_v49 = vmul.f32 0.5, %v1197_v24 }
  0xb4   : > { %v665_v60 = vmul.f32 %v664_v54, %v1230_v40  ;;  %v504_v61 = vadd.f32 0.00028619796, %v503_v55  ;;  %v1259_v8 = vmul.f32 0.70710677, %v1246_v59  ;;  %v634_v52 = vmul.f32 3.8918573e-05, %v1224_v37 }
  0xb5   : > { %v626_v63 = vadd.f32 0.0036580483, %v625_v57  ;;  %v465_v0 = vmul.f32 %v464_v58, %v1236_v44  ;;  %v541_v4 = vmul.f32 %v1249_v62, %v1249_v62  ;;  %v674_v57 = vmul.f32 3.8918573e-05, %v1230_v40 }
  0xb6   : > { %v666_v2 = vadd.f32 0.0036580483, %v665_v60  ;;  %v505_v3 = vmul.f32 %v504_v61, %v1239_v47  ;;  %v581_v14 = vmul.f32 %v1259_v8, %v1259_v8  ;;  %v635_v60 = vadd.f32 0.001143296, %v634_v52 }
  0xb7   : > { %v627_v6 = vmul.f32 %v626_v63, %v1224_v37  ;;  %v466_v7 = vadd.f32 0.0036580483, %v465_v0  ;;  %v1262_v11 = vmin.f32 %v541_v4, 16.0  ;;  %v1289_v61 = vmul.f32 3.8918573e-05, %v1212_v32 }
  0xb8   : > { %v667_v9 = vmul.f32 %v666_v2, %v1230_v40  ;;  %v506_v10 = vadd.f32 0.0036580483, %v505_v3  ;;  %v1270_v28 = vmin.f32 %v581_v14, 16.0  ;;  %v1291_v63 = vadd.f32 0.0036580483, %v425_v42 }
  0xb9   : > { %v628_v12 = vadd.f32 0.05243302, %v627_v6  ;;  %v467_v13 = vmul.f32 %v466_v7, %v1236_v44  ;;  %v543_v21 = vmul.f32 2.1237322e-06, %v1262_v11  ;;  %v675_v1 = vadd.f32 0.001143296, %v674_v57 }
  0xba   : > { %v668_v18 = vadd.f32 0.05243302, %v667_v9  ;;  %v507_v20 = vmul.f32 %v506_v10, %v1239_v47  ;;  %v583_v41 = vmul.f32 2.1237322e-06, %v1270_v28  ;;  %v1295_v2 = vadd.f32 0.05243302, %v387_v48 }
  0xbb   : > { %v629_v25 = vmul.f32 %v628_v12, %v1224_v37  ;;  %v468_v35 = vadd.f32 0.05243302, %v467_v13  ;;  %v544_v38 = vadd.f32 0.00028619796, %v543_v21  ;;  %v1297_v3 = vmul.f32 0.5, %v331_v51 }
  0xbc   : > { %v669_v33 = vmul.f32 %v668_v18, %v1230_v40  ;;  %v508_v39 = vadd.f32 0.05243302, %v507_v20  ;;  %v584_v50 = vadd.f32 0.00028619796, %v583_v41  ;;  %v636_v5 = vmul.f32 %v635_v60, %v1224_v37 }
  0xbd   : > { %v630_v45 = vadd.f32 0.18741608, %v629_v25  ;;  %v545_v46 = vmul.f32 %v544_v38, %v1262_v11  ;;  %v469_v55 = vmul.f32 %v468_v35, %v1236_v44  ;;  %v676_v10 = vmul.f32 %v675_v1, %v1230_v40 }
  0xbe   : > { %v670_v54 = vadd.f32 0.18741608, %v669_v33  ;;  %v509_v22 = vmul.f32 %v508_v39, %v1239_v47  ;;  %v585_v58 = vmul.f32 %v584_v50, %v1270_v28  ;;  %v637_v14 = vadd.f32 0.014752088, %v636_v5 }
  0xbf   : > { %v546_v56 = vadd.f32 0.0036580483, %v545_v46  ;;  %v631_v24 = vmul.f32 %v630_v45, %v1224_v37  ;;  %v470_v7 = vadd.f32 0.18741608, %v469_v55  ;;  %v554_v16 = vmul.f32 3.8918573e-05, %v1262_v11 }
  0xc0   : > { %v586_v4 = vadd.f32 0.0036580483, %v585_v58  ;;  %v671_v6 = vmul.f32 %v670_v54, %v1230_v40  ;;  %v510_v12 = vadd.f32 0.18741608, %v509_v22  ;;  %v677_v51 = vadd.f32 0.014752088, %v676_v10 }
  0xc1   : > { %v547_v0 = vmul.f32 %v546_v56, %v1262_v11  ;;  %v632_v18 = vadd.f32 1.1283791, %v631_v24  ;;  %v594_v21 = vmul.f32 3.8918573e-05, %v1270_v28  ;;  %v638_v25 = vmul.f32 %v637_v14, %v1224_v37 }
  0xc2   : > { %v587_v13 = vmul.f32 %v586_v4, %v1270_v28  ;;  %v555_v33 = vadd.f32 0.001143296, %v554_v16  ;;  %v474_v35 = vmul.f32 3.8918573e-05, %v1236_v44  ;;  %v678_v39 = vmul.f32 %v677_v51, %v1230_v40 }
  0xc3   : > { %v548_v9 = vadd.f32 0.05243302, %v547_v0  ;;  %v595_v41 = vadd.f32 0.001143296, %v594_v21  ;;  %v514_v42 = vmul.f32 3.8918573e-05, %v1239_v47  ;;  %v471_v52 = vmul.f32 %v470_v7, %v1236_v44 }
  0xc4   : > { %v588_v23 = vadd.f32 0.05243302, %v587_v13  ;;  %v639_v46 = vadd.f32 0.112945676, %v638_v25  ;;  %v556_v48 = vmul.f32 %v555_v33, %v1262_v11  ;;  %v475_v50 = vadd.f32 0.001143296, %v474_v35 }
  0xc5   : > { %v549_v20 = vmul.f32 %v548_v9, %v1262_v11  ;;  %v679_v54 = vadd.f32 0.112945676, %v678_v39  ;;  %v596_v55 = vmul.f32 %v595_v41, %v1270_v28  ;;  %v515_v56 = vadd.f32 0.001143296, %v514_v42 }
  0xc6   : > { %v589_v45 = vmul.f32 %v588_v23, %v1270_v28  ;;  %v640_v22 = vmul.f32 %v639_v46, %v1224_v37  ;;  %v557_v58 = vadd.f32 0.014752088, %v556_v48  ;;  %v476_v60 = vmul.f32 %v475_v50, %v1236_v44 }
  0xc7   : > { %v550_v38 = vadd.f32 0.18741608, %v549_v20  ;;  %v511_v24 = vmul.f32 %v510_v12, %v1239_v47  ;;  %v680_v0 = vmul.f32 %v679_v54, %v1230_v40  ;;  %v597_v1 = vadd.f32 0.014752088, %v596_v55 }
  0xc8   : > { %v590_v57 = vadd.f32 0.18741608, %v589_v45  ;;  %v516_v4 = vmul.f32 %v515_v56, %v1239_v47  ;;  %v641_v7 = vadd.f32 0.4994258, %v640_v22  ;;  %v558_v9 = vmul.f32 %v557_v58, %v1262_v11 }
  0xc9   : > { %v551_v5 = vmul.f32 %v550_v38, %v1262_v11  ;;  %v477_v10 = vadd.f32 0.014752088, %v476_v60  ;;  %v672_v13 = vadd.f32 1.1283791, %v671_v6  ;;  %v681_v14 = vadd.f32 0.4994258, %v680_v0 }
  0xca   : > { %v598_v16 = vmul.f32 %v597_v1, %v1270_v28  ;;  %v517_v20 = vadd.f32 0.014752088, %v516_v4  ;;  %v591_v51 = vmul.f32 %v590_v57, %v1270_v28  ;;  %v642_v12 = vmul.f32 %v641_v7, %v1224_v37 }
  0xcb   : > { %v559_v21 = vadd.f32 0.112945676, %v558_v9  ;;  %v478_v23 = vmul.f32 %v477_v10, %v1236_v44  ;;  %v472_v25 = vadd.f32 1.1283791, %v471_v52  ;;  %v682_v33 = vmul.f32 %v681_v14, %v1230_v40 }
  0xcc   : > { %v599_v35 = vadd.f32 0.112945676, %v598_v16  ;;  %v518_v38 = vmul.f32 %v517_v20, %v1239_v47  ;;  %v512_v39 = vadd.f32 1.1283791, %v511_v24  ;;  %v552_v41 = vadd.f32 1.1283791, %v551_v5 }
  0xcd   : > { %v1327_v6 = vadd.f32 1.0, %v642_v12  ;;  %v560_v42 = vmul.f32 %v559_v21, %v1262_v11  ;;  %v1330_v45 = vadd.f32 1.0, %v682_v33  ;;  %v479_v37 = vadd.f32 0.112945676, %v478_v23 }
  0xce   : > { %v600_v46 = vmul.f32 %v599_v35, %v1270_v28  ;;  %v519_v48 = vadd.f32 0.112945676, %v518_v38  ;;  %v1334_v50 = vmul.f32 %v632_v18, %v1200_v26  ;;  %v1337_v40 = vmul.f32 0.5, %v1246_v59 }
  0xcf   : > { %v592_v52 = vadd.f32 1.1283791, %v591_v51  ;;  %963 = vrcp.f32 %v1327_v6  ;;  %v1341_v54 = vmul.f32 %v672_v13, %v1208_v30  ;;  %v1344_v55 = vmul.f32 %v472_v25, %v1217_v34 }
  0xd0   : > { %965 = vrcp.f32 %v1330_v45  ;;  %v395_v56 = vadd.f32 0.001143296, %v1289_v61  ;;  %v1349_v57 = vmul.f32 %v512_v39, %v1222_v36  ;;  %v1352_v26 = vmul.f32 %v552_v41, %v1249_v62 }
  0xd1   : > { %v561_v59 = vadd.f32 0.4994258, %v560_v42  ;;  %v601_v18 = vadd.f32 0.4994258, %v600_v46  ;;  %v653_v22 = vand.u32 2147483647, %v1327_v6  ;;  %v480_v58 = vmul.f32 %v479_v37, %v1236_v44 }
  0xd2   : > { %v655_v30 = vand.u32 2147483648, %v1327_v6  ;;  %v520_v34 = vmul.f32 %v519_v48, %v1239_v47  ;;  %v1359_v60 = vmul.f32 %v592_v52, %v1259_v8  ;;  %v693_v61 = vand.u32 2147483647, %v1330_v45 }
  0xd3   : > { %v562_v36 = vmul.f32 %v561_v59, %v1262_v11  ;;  %v602_v62 = vmul.f32 %v601_v18, %v1270_v28  ;;  %vm649_vm2 = vweird.f32 %v1327_v6  ;;  %v481_v24 = vadd.f32 0.4994258, %v480_v58 }
  0xd4   : > { %v521_v0 = vadd.f32 0.4994258, %v520_v34  ;;  %v396_v1 = vmul.f32 %v395_v56, %v1212_v32  ;;  %vm689_vm3 = vweird.f32 %v1330_v45  ;;  %v695_v5 = vand.u32 2147483648, %v1330_v45 }
  0xd5   : > { %v964_v4 = vpop.eup %963  ;;  %v1368_v7 = vadd.f32 1.0, %v562_v36  ;;  %v1370_v8 = vadd.f32 1.0, %v602_v62  ;;  %vm1373_vm4 = vcmp.eq.f32.partialorder %v653_v22, 8.507059e+37  ;;  %v656_v10 = vor.u32 1.1754944e-38, %v655_v30 }
  0xd6   : > { %v966_v9 = vpop.eup %965  ;;  %v645_v11 = vmul.f32 %v964_v4, %v1327_v6  ;;  %v482_v13 = vmul.f32 %v481_v24, %v1236_v44  ;;  %vm1379_vm5 = vcmp.eq.f32.partialorder %v693_v61, 8.507059e+37  ;;  %v522_v20 = vmul.f32 %v521_v0, %v1239_v47 }
  0xd7   : > { %v685_v14 = vmul.f32 %v966_v9, %v1330_v45  ;;  %967 = vrcp.f32 %v1368_v7  ;;  %v397_v12 = vadd.f32 0.014752088, %v396_v1  ;;  %v434_v21 = vmul.f32 3.8918573e-05, %v1242_v53 }
  0xd8   : > { %v646_v51 = vsub.f32 1.0, %v645_v11  ;;  %969 = vrcp.f32 %v1370_v8  ;;  %vm650_vm6 = vweird.f32 %v964_v4  ;;  %v696_v25 = vor.u32 1.1754944e-38, %v695_v5 }
  0xd9   : > { %v686_v23 = vsub.f32 1.0, %v685_v14  ;;  %v573_v44 = vand.u32 2147483647, %v1368_v7  ;;  %v575_v35 = vand.u32 2147483648, %v1368_v7  ;;  %v615_v38 = vand.u32 2147483648, %v1370_v8  ;;  %vm651_vm8 = vmor %vm649_vm2, %vm650_vm6 }
  0xda   : > { %v647_v33 = vmul.f32 %v964_v4, %v646_v51  ;;  %v1390_v39 = vadd.f32 1.0, %v482_v13  ;;  %vm690_vm7 = vweird.f32 %v966_v9  ;;  %v613_v47 = vand.u32 2147483647, %v1370_v8 }
  0xdb   : > { %v687_v41 = vmul.f32 %v966_v9, %v686_v23  ;;  %v1393_v42 = vadd.f32 1.0, %v522_v20  ;;  %v398_v37 = vmul.f32 %v397_v12, %v1212_v32  ;;  %v435_v48 = vadd.f32 0.001143296, %v434_v21  ;;  %vm691_vm11 = vmor %vm689_vm3, %vm690_vm7 }
  0xdc   : > { %v648_v46 = vadd.f32 %v964_v4, %v647_v33  ;;  %971 = vrcp.f32 %v1390_v39  ;;  %vm569_vm9 = vweird.f32 %v1368_v7  ;;  %vm609_vm10 = vweird.f32 %v1370_v8 }
  0xdd   : > { %v968_v52 = vpop.eup %967  ;;  %v688_v56 = vadd.f32 %v966_v9, %v687_v41  ;;  %973 = vrcp.f32 %v1393_v42  ;;  %vm1407_vm12 = vcmp.eq.f32.partialorder %v573_v44, 8.507059e+37  ;;  %v576_v6 = vor.u32 1.1754944e-38, %v575_v35 }
  0xde   : > { %v970_v59 = vpop.eup %969  ;;  %v652_v18 = vsel %vm651_vm8, %v964_v4, %v648_v46  ;;  %v565_v22 = vmul.f32 %v968_v52, %v1368_v7  ;;  %v616_v58 = vor.u32 1.1754944e-38, %v615_v38  ;;  %vm1414_vm13 = vcmp.eq.f32.partialorder %v613_v47, 8.507059e+37 }
  0xdf   : > { %v657_v34 = vsel %vm1373_vm4, %v656_v10, %v652_v18  ;;  %v692_v61 = vsel %vm691_vm11, %v966_v9, %v688_v56  ;;  %v605_v36 = vmul.f32 %v970_v59, %v1370_v8  ;;  %v493_v45 = vand.u32 2147483647, %v1390_v39 }
  0xe0   : > { %v658_v24 = vmul.f32 %v657_v34, %v1334_v50  ;;  %v697_v0 = vsel %vm1379_vm5, %v696_v25, %v692_v61  ;;  %v566_v1 = vsub.f32 1.0, %v565_v22  ;;  %v495_v4 = vand.u32 2147483648, %v1390_v39 }
  0xe1   : > { %v698_v5 = vmul.f32 %v697_v0, %v1341_v54  ;;  %vm570_vm14 = vweird.f32 %v968_v52  ;;  %v606_v9 = vsub.f32 1.0, %v605_v36  ;;  %vm610_vm15 = vweird.f32 %v970_v59 }
  0xe2   : > { %vm489_vm1 = vweird.f32 %v1390_v39  ;;  %v972_v11 = vpop.eup %971  ;;  %v891_v28 = vclamps-f32 %v658_v24, 1.0  ;;  %v567_v10 = vmul.f32 %v968_v52, %v566_v1  ;;  %vm529_vm2 = vweird.f32 %v1393_v42  ;;  %vm571_vm4 = vmor %vm569_vm9, %vm570_vm14 }
  0xe3   : > { %v533_v50 = vand.u32 2147483647, %v1393_v42  ;;  %v535_v13 = vand.u32 2147483648, %v1393_v42  ;;  %v974_v14 = vpop.eup %973  ;;  %v892_v16 = vclamps-f32 %v698_v5, 1.0  ;;  %v607_v20 = vmul.f32 %v970_v59, %v606_v9  ;;  %vm611_vm6 = vmor %vm609_vm10, %vm610_vm15 }
  0xe4   : > { %v485_v51 = vmul.f32 %v972_v11, %v1390_v39  ;;  %vm1429_vm3 = vcmp.eq.f32.partialorder %v493_v45, 8.507059e+37  ;;  %v399_v12 = vadd.f32 0.112945676, %v398_v37  ;;  %v707_v21 = vadd.f32 1.0, %v891_v28 }
  0xe5   : > { %v568_v23 = vadd.f32 %v968_v52, %v567_v10  ;;  %v525_v25 = vmul.f32 %v974_v14, %v1393_v42  ;;  %v436_v44 = vmul.f32 %v435_v48, %v1242_v53  ;;  %v708_v33 = vadd.f32 1.0, %v892_v16 }
  0xe6   : > { %v608_v35 = vadd.f32 %v970_v59, %v607_v20  ;;  %v486_v38 = vsub.f32 1.0, %v485_v51  ;;  %vm490_vm5 = vweird.f32 %v972_v11  ;;  %v715_v41 = vmul.f32 %v707_v21, %v1276_v43 }
  0xe7   : > { %v572_v47 = vsel %vm571_vm4, %v968_v52, %v568_v23  ;;  %v526_v46 = vsub.f32 1.0, %v525_v25  ;;  %vm530_vm7 = vweird.f32 %v974_v14  ;;  %v716_v37 = vmul.f32 %v708_v33, %v1281_v49  ;;  %vm491_vm8 = vmor %vm489_vm1, %vm490_vm5 }
  0xe8   : > { %v577_v48 = vsel %vm1407_vm12, %v576_v6, %v572_v47  ;;  %v612_v56 = vsel %vm611_vm6, %v970_v59, %v608_v35  ;;  %v487_v7 = vmul.f32 %v972_v11, %v486_v38  ;;  %738 = vmatpush.msrb.mxu2 %v715_v41  ;;  %v400_v22 = vmul.f32 %v399_v12, %v1212_v32  ;;  %vm531_vm10 = vmor %vm529_vm2, %vm530_vm7 }
  0xe9   : > { %v578_v18 = vmul.f32 %v577_v48, %v1352_v26  ;;  %v617_v43 = vsel %vm1414_vm13, %v616_v58, %v612_v56  ;;  %v527_v52 = vmul.f32 %v974_v14, %v526_v46  ;;  %758 = vmatpush.msrb.mxu3 %v716_v37  ;;  %v496_v61 = vor.u32 1.1754944e-38, %v495_v4 }
  0xea   : > { %v618_v8 = vmul.f32 %v617_v43, %v1359_v60  ;;  %v488_v34 = vadd.f32 %v972_v11, %v487_v7  ;;  %v437_v49 = vadd.f32 0.014752088, %v436_v44  ;;  %vm534_vm9 = vcmp.eq.f32.partialorder %v533_v50, 8.507059e+37 }
  0xeb   : > { %v889_v36 = vclamps-f32 %v578_v18, 1.0  ;;  %v528_v59 = vadd.f32 %v974_v14, %v527_v52  ;;  %v401_v26 = vadd.f32 0.4994258, %v400_v22  ;;  %v536_v58 = vor.u32 1.1754944e-38, %v535_v13 }
  0xec   : > { %v890_v30 = vclamps-f32 %v618_v8, 1.0  ;;  %v492_v6 = vsel %vm491_vm8, %v972_v11, %v488_v34  ;;  %v438_v60 = vmul.f32 %v437_v49, %v1242_v53  ;;  %v427_v9 = vmul.f32 %v1291_v63, %v1242_v53 }
  0xed   : > { %v705_v62 = vadd.f32 1.0, %v889_v36  ;;  %v497_v45 = vsel %vm1429_vm3, %v496_v61, %v492_v6  ;;  %v532_v24 = vsel %vm531_vm10, %v974_v14, %v528_v59  ;;  %v402_v39 = vmul.f32 %v401_v26, %v1212_v32 }
  0xee   : > { %v706_v0 = vadd.f32 1.0, %v890_v30  ;;  %v498_v1 = vmul.f32 %v497_v45, %v1344_v55  ;;  %v537_v4 = vsel %vm534_vm9, %v536_v58, %v532_v24  ;;  %v439_v5 = vadd.f32 0.112945676, %v438_v60  ;;  %v258_v45 = vld [vmem:[%s1526_s3] sm:$0xf] }
  0xef   : > { %v713_v42 = vmul.f32 %v705_v62, %v1297_v3  ;;  %v538_v11 = vmul.f32 %v537_v4, %v1349_v57  ;;  %v403_v28 = vadd.f32 1.0, %v402_v39  ;;  %v389_v10 = vmul.f32 %v1295_v2, %v1212_v32  ;;  %v263_v2 = vld [vmem:[%s1527_s4] sm:$0xf] }
  0xf0   : > { %v714_v50 = vmul.f32 %v706_v0, %v1337_v40  ;;  %v887_v13 = vclamps-f32 %v498_v1, 1.0  ;;  %v440_v14 = vmul.f32 %v439_v5, %v1242_v53  ;;  %v367_v16 = vmul.f32 0.5, %v1202_v27  ;;  %719 = vperm.xlu2 %962, %v263_v2  }
  0xf1   : > { %739 = vmatpush.msrb.mxu2 %v713_v42  ;;  %v888_v55 = vclamps-f32 %v538_v11, 1.0  ;;  %975 = vrcp.f32 %v403_v28  ;;  %v428_v3 = vadd.f32 0.05243302, %v427_v9  ;;  %v368_v57 = vmul.f32 0.5, %v1210_v31 }
  0xf2   : > { %759 = vmatpush.msrb.mxu3 %v714_v50  ;;  %v703_v63 = vadd.f32 1.0, %v887_v13  ;;  %v441_v20 = vadd.f32 0.4994258, %v440_v14  ;;  %v390_v40 = vadd.f32 0.18741608, %v389_v10  ;;  %v415_v38 = vand.u32 2147483648, %v403_v28 }
  0xf3   : > { %v704_v51 = vadd.f32 1.0, %v888_v55  ;;  %v429_v25 = vmul.f32 %v428_v3, %v1242_v53  ;;  %v413_v46 = vand.u32 2147483647, %v403_v28  ;;  %vm409_vm12 = vweird.f32 %v403_v28 }
  0xf4   : > { %v711_v54 = vmul.f32 %v703_v63, %v367_v16  ;;  %v442_v12 = vmul.f32 %v441_v20, %v1242_v53  ;;  %v391_v44 = vmul.f32 %v390_v40, %v1212_v32  ;;  %v416_v7 = vor.u32 1.1754944e-38, %v415_v38 }
  0xf5   : > { %v712_v21 = vmul.f32 %v704_v51, %v368_v57  ;;  %v430_v35 = vadd.f32 0.18741608, %v429_v25  ;;  %vm414_vm14 = vcmp.eq.f32.partialorder %v413_v46, 8.507059e+37  ;;  %vm722_vm4 = vcmask 261120  }
  0xf6   : > { %740 = vmatpush.msrb.mxu2 %v711_v54  ;;  %v443_v23 = vadd.f32 1.0, %v442_v12  ;;  %v392_v41 = vadd.f32 1.1283791, %v391_v44 }
  0xf7   : > { %v976_v27 = vpop.eup %975  ;;  %760 = vmatpush.msrb.mxu3 %v712_v21  ;;  %v431_v56 = vmul.f32 %v430_v35, %v1242_v53  ;;  %v365_v53 = vmul.f32 0.5, %v1186_v15  ;;  %v366_v15 = vmul.f32 0.5, %v1191_v19 }
  0xf8   : > { %v405_v31 = vmul.f32 %v976_v27, %v403_v28  ;;  %977 = vrcp.f32 %v443_v23  ;;  %vm410_vm11 = vweird.f32 %v976_v27  ;;  %v393_v43 = vmul.f32 %v392_v41, %v1189_v17 }
  0xf9   : > { %vm411_vm13 = vmor %vm409_vm12, %vm410_vm11  ;;  %v455_v34 = vand.u32 2147483648, %v443_v23  ;;  %v432_v61 = vadd.f32 1.1283791, %v431_v56  ;;  %v453_v36 = vand.u32 2147483647, %v443_v23  ;;  %vm449_vm1 = vweird.f32 %v443_v23 }
  0xfa   : > { %v406_v33 = vsub.f32 1.0, %v405_v31 }
  0xfb   : > { %v456_v6 = vor.u32 1.1754944e-38, %v455_v34  ;;  %v433_v17 = vmul.f32 %v432_v61, %v1205_v29  ;;  %vm454_vm3 = vcmp.eq.f32.partialorder %v453_v36, 8.507059e+37 }
  0xfc   : > { %v407_v47 = vmul.f32 %v976_v27, %v406_v33 }
  0xfe   : > { %v978_v37 = vpop.eup %977  ;;  %v408_v48 = vadd.f32 %v976_v27, %v407_v47 }
  0xff   : > { %v445_v18 = vmul.f32 %v978_v37, %v443_v23  ;;  %vm450_vm15 = vweird.f32 %v978_v37 }
 0x100   : > { %v412_v32 = vsel %vm411_vm13, %v976_v27, %v408_v48  ;;  %vm451_vm2 = vmor %vm449_vm1, %vm450_vm15 }
 0x101   : > { %v417_v52 = vsel %vm414_vm14, %v416_v7, %v412_v32  ;;  %v446_v22 = vsub.f32 1.0, %v445_v18 }
 0x102   : > { %v418_v8 = vmul.f32 %v417_v52, %v393_v43 }
 0x103   : > { %v447_v49 = vmul.f32 %v978_v37, %v446_v22 }
 0x104   : > { %v885_v59 = vclamps-f32 %v418_v8, 1.0 }
 0x105   : > { %v448_v26 = vadd.f32 %v978_v37, %v447_v49 }
 0x106   : > { %v701_v30 = vadd.f32 1.0, %v885_v59 }
 0x107   : > { %v452_v58 = vsel %vm451_vm2, %v978_v37, %v448_v26 }
 0x108   : > { %v709_v60 = vmul.f32 %v701_v30, %v365_v53  ;;  %v457_v62 = vsel %vm454_vm3, %v456_v6, %v452_v58 }
 0x109   : > { %v458_v24 = vmul.f32 %v457_v62, %v433_v17 }
 0x10a   : > { %741 = vmatpush.msrb.mxu2 %v709_v60 }
 0x10b   : > { %v886_v39 = vclamps-f32 %v458_v24, 1.0  ;;  %893 = vmatmul.msk.f32.vlgmr.msrb.gmra.mxu2 %vm722_vm4, %v258_v45 }
 0x10d   : > { %v702_v0 = vadd.f32 1.0, %v886_v39 }
 0x10f   : > { %v710_v1 = vmul.f32 %v702_v0, %v366_v15 }
 0x111   : > { %761 = vmatpush.msrb.mxu3 %v710_v1 }
 0x112   : > { %894 = vmatmul.msk.f32.vlgmr.msrb.gmra.mxu3 %vm722_vm4, %v258_v45 }
 0x14a   : > { %v720_v29 = vpop.permute.xlu2 %719 }
 0x18e   : > { %v743_v5 = vpop.f32.mrf.mxu2 }
 0x18f   : > { %v744_v42 = vadd.f32 %v743_v5, %v720_v29 }
 0x195   : > { %v763_v4 = vpop.f32.mrf.mxu3 }
 0x196   : > { %v764_v9 = vadd.f32 %v763_v4, %v720_v29 }
 0x198   : > { %v768_v19 = vrot.slane %v764_v9, 4 }
 0x19a   : > { %v769_v11 = vsel %vm302_vm0, %v744_v42, %v768_v19 }
 0x19b   : > { %771 = vst [vmem:[%s242_s8] sm:$0xff] %v769_v11 }
 0x19c   : > { %1006 = shalt.err (!%p1003_p5)
}
 0x19d   : > { %904 = dma.vmem_to_hbm [thread:$0]  (%p1130_p4), %s789_s9, 128, %s791_s10, %s773_s21  }
 0x19e PF: > { %p910_p6 = scmp.ge.s32.totalorder %s1057_s23, 2  ;;  %s802_s17 = sand.u32 1, %s1037_s18  }
 0x19f   : > { %s803_s25 = scalar_lea.sflag [#allocation3], %s802_s17 }
 0x1a0   : > { %p907_p7 = pnand %p910_p6, %p1137_p8 }
 0x1a2   : > { %p908_p9 = pneg %p907_p7 }
 0x1a4   : > { %1032 = dma.done.wait (%p908_p9), %s803_s25, 128  }
 0x1a5   : > { %1034 = vsyncadd (%p908_p9), %s803_s25, 4294967168  ;;  %s18_s23 = sadd.s32 1, %s1057_s23   ;;  %s1541_s18 = smov %s1041_s19 }
 0x1a6   : > { %p15_p10 = scmp.ge.s32.totalorder %s18_s23, 4   ;;  %s1542_s19 = smov %s1045_s20 }
 0x1a7   : > { %s1543_s20 = smov %s1143_s6  ;;  %s1544_s21 = smov %s1053_s22 }
 0x1a8   : > { %s1545_s22 = smov %s1547_s26  ;;  %17 = sbr.rel (!%p15_p10) target bundleno = 4 (0x4), region = 75 }
 0x1ad   :  { %809 = vsyncpa [#allocation3], 1 }
 0x1ae   :  { %811 = vsyncpa [#allocation3 + $0x1], 1 }

</bundles_post_ra>
